<compile_context>
chip_gen: v5e
topology: v5e:2x2
jax: 0.10.0
libtpu: 0.0.40
codegen_flags: <defaults>
</compile_context>

<pallas_src>
import math
from functools import partial

import jax
import jax.numpy as jnp
from jax import lax
from jax.experimental import pallas as pl
from jax.experimental.pallas import tpu as pltpu


# ----------------------------------------------------------------------------
# Generation-aware budgets
# ----------------------------------------------------------------------------

def _vmem_limit_bytes():
    try:
        info = pltpu.get_tpu_info()
        cap = int(getattr(info, "vmem_capacity_bytes", 0) or (128 << 20))
    except Exception:
        return 32 << 20  # conservative fallback
    # ~3/4 of physical VMEM, capped at 96 MiB (v5e/v6e), ~48 MiB on v7x.
    return max(32 << 20, min((cap * 3) // 4, 96 << 20))


_VMEM_LIMIT = _vmem_limit_bytes()
_BIG_VMEM = _VMEM_LIMIT >= (80 << 20)


def _transcendental_dtype():
    """bf16 EUP exists on v6e/v7x; keep f32 on v5e/v5p/v4."""
    try:
        kind = jax.devices()[0].device_kind.lower()
    except Exception:
        return jnp.float32
    if ("v6" in kind) or ("v7" in kind) or ("tpu7" in kind):
        return jnp.bfloat16
    return jnp.float32


_TRANS_DTYPE = _transcendental_dtype()


def _pick_tile(dim, desired, align):
    """Largest multiple of `align` <= `desired` that evenly divides `dim`;
    falls back to the full dimension (full-extent blocks bypass (8,128))."""
    if dim <= desired or dim % align != 0:
        return dim
    t = (desired // align) * align
    while t >= align:
        if dim % t == 0:
            return t
        t -= align
    return dim


# ----------------------------------------------------------------------------
# Kernel 1: tiled matmul + bias (fused QKV projection)
# ----------------------------------------------------------------------------

def _matmul_bias_kernel(x_ref, w_ref, b_ref, o_ref, acc_ref, *, compute_dtype):
    k = pl.program_id(2)

    @pl.when(k == 0)
    def _():
        acc_ref[...] = jnp.zeros_like(acc_ref)

    acc_ref[...] += jnp.dot(
        x_ref[...].astype(compute_dtype),
        w_ref[...].astype(compute_dtype),
        preferred_element_type=jnp.float32,
    )

    @pl.when(k == pl.num_programs(2) - 1)
    def _():
        o_ref[...] = (acc_ref[...] + b_ref[...].astype(jnp.float32)).astype(o_ref.dtype)


def matmul_bias(x, w, b, *, out_dtype=None, compute_dtype=jnp.bfloat16,
                tm=None, tn=None, tk=None):
    M, K = x.shape
    Kw, N = w.shape
    assert K == Kw
    if out_dtype is None:
        out_dtype = x.dtype
    if tm is None:
        tm = 512 if _BIG_VMEM else 256
    if tk is None:
        tk = 1024 if _BIG_VMEM else 512
    bm = _pick_tile(M, tm, 8)
    bk = _pick_tile(K, tk, 128)
    if tn is None:
        # Single N block when the double-buffered weight K-strip + accumulator
        # fit a third of the budget -> x fetched once per (i, k), not per (i,j,k).
        w_bytes = 2 * N * bk * jnp.dtype(w.dtype).itemsize
        acc_bytes = 4 * bm * N
        tn = N if (w_bytes + acc_bytes) <= _VMEM_LIMIT // 3 else 256
    bn = _pick_tile(N, tn, 128)
    grid = (M // bm, N // bn, K // bk)
    xb = jnp.dtype(x.dtype).itemsize
    wb = jnp.dtype(w.dtype).itemsize
    ob = jnp.dtype(out_dtype).itemsize
    cost = pl.CostEstimate(
        flops=int(2 * M * N * K),
        transcendentals=0,
        bytes_accessed=int(xb * M * K + wb * K * N + ob * M * N),
    )
    return pl.pallas_call(
        partial(_matmul_bias_kernel, compute_dtype=compute_dtype),
        out_shape=jax.ShapeDtypeStruct((M, N), out_dtype),
        grid_spec=pltpu.PrefetchScalarGridSpec(
            num_scalar_prefetch=0,
            grid=grid,
            in_specs=[
                pl.BlockSpec((bm, bk), lambda i, j, k: (i, k)),
                pl.BlockSpec((bk, bn), lambda i, j, k: (k, j)),
                pl.BlockSpec((1, bn), lambda i, j, k: (0, j)),
            ],
            out_specs=pl.BlockSpec((bm, bn), lambda i, j, k: (i, j)),
            scratch_shapes=[pltpu.VMEM((bm, bn), jnp.float32)],
        ),
        compiler_params=pltpu.CompilerParams(
            dimension_semantics=("parallel", "parallel", "arbitrary"),
            vmem_limit_bytes=_VMEM_LIMIT,
        ),
        cost_estimate=cost,
    )(x, w, b.reshape(1, N))


# ----------------------------------------------------------------------------
# Kernel 2: multi-head self-attention, tiled over (batch, query rows)
# ----------------------------------------------------------------------------

def _attention_kernel(qkv_ref, mask_ref, o_ref, ctx_slab, *, num_heads,
                      head_dim, q_tile, compute_dtype, trans_dtype):
    H = num_heads * head_dim
    qi = pl.program_id(1)
    q0 = pl.multiple_of(qi * q_tile, q_tile)

    # query rows for this tile, all heads at once (one load)
    q_all = qkv_ref[0, pl.ds(q0, q_tile), :]           # (tq, 3H)
    mask = mask_ref[0, 0].astype(jnp.float32)          # (tq, L), additive

    for h in range(num_heads):                          # static unroll
        lo = h * head_dim
        q = q_all[:, lo:lo + head_dim].astype(compute_dtype)            # (tq, Dh)
        k = qkv_ref[0, :, H + lo:H + lo + head_dim].astype(compute_dtype)     # (L, Dh)
        v = qkv_ref[0, :, 2 * H + lo:2 * H + lo + head_dim].astype(compute_dtype)

        # 1/sqrt(Dh) is folded into Wq/bq at init -> no scale here.
        # Contract last dims so K is consumed without an in-kernel transpose.
        s = lax.dot_general(q, k, (((1,), (1,)), ((), ())),
                            preferred_element_type=jnp.float32)          # (tq, L)
        s = s + mask
        s = s - jnp.max(s, axis=-1, keepdims=True)
        p = jnp.exp(s.astype(trans_dtype))                # bf16 EUP on v6e/v7x
        denom = jnp.sum(p.astype(jnp.float32), axis=-1, keepdims=True)

        ctx = jnp.dot(p.astype(compute_dtype), v,
                      preferred_element_type=jnp.float32)                # (tq, Dh)
        # apply softmax denominator after PV (tq*Dh mults instead of tq*L)
        ctx = ctx * pl.reciprocal(denom, approx=True)
        ctx_slab[:, lo:lo + head_dim] = ctx               # static lane offset

    # single lane-dense store of all heads (last dim = H)
    o_ref[0] = ctx_slab[...].astype(o_ref.dtype)


def attention_core(qkv, attention_mask, *, num_heads,
                   compute_dtype=jnp.bfloat16, trans_dtype=None, tq=None):
    """qkv: (B, L, 3H); attention_mask: additive (B, 1, L, L) -> (B, L, H)."""
    B, L, H3 = qkv.shape
    H = H3 // 3
    Dh = H // num_heads
    if trans_dtype is None:
        trans_dtype = _TRANS_DTYPE
    if tq is None:
        tq = _pick_tile(L, 256, 8)      # >=256 rows keeps the MXU M-dim full
    nq = L // tq
    mb = jnp.dtype(attention_mask.dtype).itemsize
    qb = jnp.dtype(qkv.dtype).itemsize
    cost = pl.CostEstimate(
        flops=int(4 * B * num_heads * L * L * Dh),
        transcendentals=int(B * num_heads * L * L),
        bytes_accessed=int(qb * B * L * H3 + mb * B * L * L + qb * B * L * H),
    )
    return pl.pallas_call(
        partial(_attention_kernel, num_heads=num_heads, head_dim=Dh,
                q_tile=tq, compute_dtype=compute_dtype, trans_dtype=trans_dtype),
        out_shape=jax.ShapeDtypeStruct((B, L, H), qkv.dtype),
        grid_spec=pltpu.PrefetchScalarGridSpec(
            num_scalar_prefetch=0,
            grid=(B, nq),
            in_specs=[
                # full K/V (and Q source) rows for batch b; block index is
                # constant across qi -> DMAed once per b, revisited.
                pl.BlockSpec((1, L, H3), lambda b, qi: (b, 0, 0)),
                # mask streamed per query tile, stays bf16 in HBM
                pl.BlockSpec((1, 1, tq, L), lambda b, qi: (b, 0, qi, 0)),
            ],
            out_specs=pl.BlockSpec((1, tq, H), lambda b, qi: (b, qi, 0)),
            scratch_shapes=[pltpu.VMEM((tq, H), jnp.float32)],
        ),
        compiler_params=pltpu.CompilerParams(
            dimension_semantics=("parallel", "parallel"),
            vmem_limit_bytes=_VMEM_LIMIT,
        ),
        cost_estimate=cost,
    )(qkv, attention_mask)


# ----------------------------------------------------------------------------
# Kernel 3: matmul + bias + residual add + LayerNorm (output projection)
# ----------------------------------------------------------------------------

def _matmul_residual_ln_kernel(x_ref, w_ref, b_ref, res_ref, g_ref, bb_ref,
                               o_ref, acc_ref, *, eps, compute_dtype):
    k = pl.program_id(1)

    @pl.when(k == 0)
    def _():
        acc_ref[...] = jnp.zeros_like(acc_ref)

    acc_ref[...] += jnp.dot(
        x_ref[...].astype(compute_dtype),
        w_ref[...].astype(compute_dtype),
        preferred_element_type=jnp.float32,
    )

    @pl.when(k == pl.num_programs(1) - 1)
    def _():
        y = (acc_ref[...] + b_ref[...].astype(jnp.float32)
             + res_ref[...].astype(jnp.float32))
        mu = jnp.mean(y, axis=-1, keepdims=True)
        var = jnp.mean((y - mu) * (y - mu), axis=-1, keepdims=True)
        yn = (y - mu) * lax.rsqrt(var + eps)
        o_ref[...] = (yn * g_ref[...].astype(jnp.float32)
                      + bb_ref[...].astype(jnp.float32)).astype(o_ref.dtype)


def matmul_residual_layernorm(x, w, b, residual, gamma, beta, *,
                              eps=1e-12, out_dtype=None,
                              compute_dtype=jnp.bfloat16, tm=None, tk=None):
    M, K = x.shape
    Kw, N = w.shape
    assert K == Kw and residual.shape == (M, N)
    if out_dtype is None:
        out_dtype = x.dtype
    if tm is None:
        tm = 512 if _BIG_VMEM else 256
    if tk is None:
        tk = 1024 if _BIG_VMEM else 512
    bm = _pick_tile(M, tm, 8)
    bk = _pick_tile(K, tk, 128)
    grid = (M // bm, K // bk)          # LayerNorm needs the full row -> N untiled
    cost = pl.CostEstimate(
        flops=int(2 * M * N * K + 10 * M * N),
        transcendentals=int(M),
        bytes_accessed=int(2 * (M * K + K * N) + 4 * 2 * M * N),
    )
    return pl.pallas_call(
        partial(_matmul_residual_ln_kernel, eps=eps, compute_dtype=compute_dtype),
        out_shape=jax.ShapeDtypeStruct((M, N), out_dtype),
        grid_spec=pltpu.PrefetchScalarGridSpec(
            num_scalar_prefetch=0,
            grid=grid,
            in_specs=[
                pl.BlockSpec((bm, bk), lambda i, k: (i, k)),   # matmul input
                pl.BlockSpec((bk, N), lambda i, k: (k, 0)),    # Wo slice
                pl.BlockSpec((1, N), lambda i, k: (0, 0)),     # bias
                pl.BlockSpec((bm, N), lambda i, k: (i, 0)),    # residual
                pl.BlockSpec((1, N), lambda i, k: (0, 0)),     # gamma
                pl.BlockSpec((1, N), lambda i, k: (0, 0)),     # beta
            ],
            out_specs=pl.BlockSpec((bm, N), lambda i, k: (i, 0)),
            scratch_shapes=[pltpu.VMEM((bm, N), jnp.float32)],
        ),
        compiler_params=pltpu.CompilerParams(
            dimension_semantics=("parallel", "arbitrary"),
            vmem_limit_bytes=_VMEM_LIMIT,
        ),
        cost_estimate=cost,
    )(x, w, b.reshape(1, N), residual, gamma.reshape(1, N), beta.reshape(1, N))


# ----------------------------------------------------------------------------
# Kernel 4: fused FFN (x@W1 + b1 -> GELU -> @W2 + b2) + residual + LayerNorm
# ----------------------------------------------------------------------------

def _ffn_kernel(x_ref, w1_ref, b1_ref, w2_ref, b2_ref, g_ref, bb_ref,
                o_ref, acc_ref, *, eps, compute_dtype, trans_dtype):
    j = pl.program_id(1)

    @pl.when(j == 0)
    def _():
        acc_ref[...] = jnp.zeros_like(acc_ref)

    x = x_ref[...].astype(compute_dtype)
    h = jnp.dot(x, w1_ref[...].astype(compute_dtype),
                preferred_element_type=jnp.float32)
    h = h + b1_ref[...].astype(jnp.float32)
    # tanh-approx GELU; tanh on the EUP (bf16 on v6e/v7x, f32 on v5e).
    u = 0.7978845608028654 * (h + 0.044715 * h * h * h)
    t = jnp.tanh(u.astype(trans_dtype)).astype(jnp.float32)
    h = 0.5 * h * (1.0 + t)
    acc_ref[...] += jnp.dot(h.astype(compute_dtype),
                            w2_ref[...].astype(compute_dtype),
                            preferred_element_type=jnp.float32)

    @pl.when(j == pl.num_programs(1) - 1)
    def _():
        y = (acc_ref[...] + b2_ref[...].astype(jnp.float32)
             + x_ref[...].astype(jnp.float32))          # residual = x
        mu = jnp.mean(y, axis=-1, keepdims=True)
        var = jnp.mean((y - mu) * (y - mu), axis=-1, keepdims=True)
        yn = (y - mu) * lax.rsqrt(var + eps)
        o_ref[...] = (yn * g_ref[...].astype(jnp.float32)
                      + bb_ref[...].astype(jnp.float32)).astype(o_ref.dtype)


def ffn_residual_layernorm(x, w1, b1, w2, b2, gamma, beta, *,
                           eps=1e-12, out_dtype=None,
                           compute_dtype=jnp.bfloat16, trans_dtype=None,
                           tm=256, ti=256):
    M, H = x.shape
    Hw, I = w1.shape
    assert H == Hw and w2.shape == (I, H)
    if out_dtype is None:
        out_dtype = x.dtype
    if trans_dtype is None:
        trans_dtype = _TRANS_DTYPE
    bm = _pick_tile(M, tm, 8)
    bi = _pick_tile(I, ti, 128)        # 256 keeps the GELU intermediate small
    grid = (M // bm, I // bi)          # intermediate (bm, bi) never touches HBM
    cost = pl.CostEstimate(
        flops=int(4 * M * I * H),
        transcendentals=int(M * I),
        bytes_accessed=int(2 * (2 * M * H + 2 * H * I)),
    )
    return pl.pallas_call(
        partial(_ffn_kernel, eps=eps, compute_dtype=compute_dtype,
                trans_dtype=trans_dtype),
        out_shape=jax.ShapeDtypeStruct((M, H), out_dtype),
        grid_spec=pltpu.PrefetchScalarGridSpec(
            num_scalar_prefetch=0,
            grid=grid,
            in_specs=[
                pl.BlockSpec((bm, H), lambda i, j: (i, 0)),   # x (also residual)
                pl.BlockSpec((H, bi), lambda i, j: (0, j)),   # W1 slice
                pl.BlockSpec((1, bi), lambda i, j: (0, j)),   # b1 slice
                pl.BlockSpec((bi, H), lambda i, j: (j, 0)),   # W2 slice
                pl.BlockSpec((1, H), lambda i, j: (0, 0)),    # b2
                pl.BlockSpec((1, H), lambda i, j: (0, 0)),    # gamma
                pl.BlockSpec((1, H), lambda i, j: (0, 0)),    # beta
            ],
            out_specs=pl.BlockSpec((bm, H), lambda i, j: (i, 0)),
            scratch_shapes=[pltpu.VMEM((bm, H), jnp.float32)],
        ),
        compiler_params=pltpu.CompilerParams(
            dimension_semantics=("parallel", "arbitrary"),
            vmem_limit_bytes=_VMEM_LIMIT,
        ),
        cost_estimate=cost,
    )(x, w1, b1.reshape(1, I), w2, b2.reshape(1, H),
      gamma.reshape(1, H), beta.reshape(1, H))


# ----------------------------------------------------------------------------
# Block / encoder wrappers (glue in plain JAX; only cheap reshapes/casts)
# ----------------------------------------------------------------------------

def fuse_block_params(p, num_heads, weight_dtype=jnp.bfloat16):
    """Concatenate Wq|Wk|Wv once (and biases); fold 1/sqrt(Dh) into Wq/bq, and
    store the big matrices in bf16 (halves weight DMA & double-buffer VMEM)."""
    H = p["Wq"].shape[0]
    Dh = H // num_heads
    scale = 1.0 / math.sqrt(Dh)
    fused = dict(p)
    fused["Wqkv"] = jnp.concatenate(
        [p["Wq"] * scale, p["Wk"], p["Wv"]], axis=1).astype(weight_dtype)
    fused["bqkv"] = jnp.concatenate(
        [p["bq"] * scale, p["bk"], p["bv"]], axis=0)          # bias stays f32
    fused["Wo"] = p["Wo"].astype(weight_dtype)
    fused["W1"] = p["W1"].astype(weight_dtype)
    fused["W2"] = p["W2"].astype(weight_dtype)
    return fused


def mstrec_block_forward(hidden_states, attention_mask, p, args,
                         compute_dtype=jnp.bfloat16):
    """hidden_states: (B, L, H); attention_mask: additive (B, 1, L, L)."""
    B, L, H = hidden_states.shape
    nH = args.num_attention_heads
    assert H % nH == 0

    x = hidden_states.reshape(B * L, H)

    # fused Q/K/V projection (scale folded into Wq/bq); output kept bf16 in HBM
    qkv = matmul_bias(x, p["Wqkv"], p["bqkv"],
                      out_dtype=jnp.bfloat16, compute_dtype=compute_dtype)
    qkv = qkv.reshape(B, L, 3 * H)           # free row-major reshape

    # self-attention; heads handled in-kernel, query-tiled, H stays on lanes
    ctx = attention_core(qkv, attention_mask, num_heads=nH,
                         compute_dtype=compute_dtype)
    ctx = ctx.reshape(B * L, H)

    # output projection fused with residual-add + LayerNorm (bf16 activation)
    attn_out = matmul_residual_layernorm(ctx, p["Wo"], p["bo"], x,
                                         p["ln1_g"], p["ln1_b"],
                                         out_dtype=jnp.bfloat16,
                                         compute_dtype=compute_dtype)

    # fused FFN (GELU) with residual-add + LayerNorm epilogue
    out = ffn_residual_layernorm(attn_out, p["W1"], p["b1"], p["W2"], p["b2"],
                                 p["ln2_g"], p["ln2_b"],
                                 out_dtype=hidden_states.dtype,
                                 compute_dtype=compute_dtype)

    return out.reshape(B, L, H)


def mst_encoder_forward(hidden_states, attention_mask, params, args,
                        output_all_encoded_layers=False,
                        compute_dtype=jnp.bfloat16):
    # Cast the additive mask to bf16 once (shared by all layers): halves the
    # B*L^2 mask DMA per layer and the mask's double-buffered VMEM.
    mask_bf16 = attention_mask.astype(jnp.bfloat16)
    all_encoder_layers = [hidden_states]
    for layer_params in params:
        hidden_states = mstrec_block_forward(hidden_states, mask_bf16,
                                             layer_params, args,
                                             compute_dtype=compute_dtype)
        if output_all_encoded_layers:
            all_encoder_layers.append(hidden_states)
    if not output_all_encoded_layers:
        all_encoder_layers.append(hidden_states)
    return all_encoder_layers


# ----------------------------------------------------------------------------
# Deterministic parameter init
# ----------------------------------------------------------------------------

def init_params(args, key):
    H = args.hidden_size
    I = args.intermediate_size
    params = []
    for layer in range(args.num_hidden_layers):
        keys = jax.random.split(jax.random.fold_in(key, layer), 6)
        p = {
            "Wq": 0.02 * jax.random.normal(keys[0], (H, H), jnp.float32),
            "bq": jnp.zeros((H,), jnp.float32),
            "Wk": 0.02 * jax.random.normal(keys[1], (H, H), jnp.float32),
            "bk": jnp.zeros((H,), jnp.float32),
            "Wv": 0.02 * jax.random.normal(keys[2], (H, H), jnp.float32),
            "bv": jnp.zeros((H,), jnp.float32),
            "Wo": 0.02 * jax.random.normal(keys[3], (H, H), jnp.float32),
            "bo": jnp.zeros((H,), jnp.float32),
            "W1": 0.02 * jax.random.normal(keys[4], (H, I), jnp.float32),
            "b1": jnp.zeros((I,), jnp.float32),
            "W2": 0.02 * jax.random.normal(keys[5], (I, H), jnp.float32),
            "b2": jnp.zeros((H,), jnp.float32),
            "ln1_g": jnp.ones((H,), jnp.float32),
            "ln1_b": jnp.zeros((H,), jnp.float32),
            "ln2_g": jnp.ones((H,), jnp.float32),
            "ln2_b": jnp.zeros((H,), jnp.float32),
        }
        params.append(fuse_block_params(p, args.num_attention_heads))
    return params


# ----------------------------------------------------------------------------
# Main
# ----------------------------------------------------------------------------

if __name__ == "__main__":
    class Args:
        pass

    args = Args()
    args.num_hidden_layers = 2
    args.hidden_size = 32
    args.num_attention_heads = 2
    args.intermediate_size = 64

    B, L = 2, 8

    key = jax.random.PRNGKey(0)
    k_hidden, k_params = jax.random.split(key)

    hidden_states = jax.random.normal(k_hidden, (B, L, args.hidden_size),
                                      dtype=jnp.float32)

    # Extended additive attention mask (B, 1, L, L): causal + all-visible rows,
    # 0.0 where attention is allowed and -10000.0 where it is blocked.
    base_mask = jnp.ones((B, L), jnp.float32)
    ext = base_mask[:, None, None, :]                                    # (B,1,1,L)
    causal = jnp.tril(jnp.ones((L, L), jnp.float32))[None, None, :, :]   # (1,1,L,L)
    attention_mask = (1.0 - ext * causal) * -10000.0                     # (B,1,L,L)

    params = init_params(args, k_params)

    outs = mst_encoder_forward(hidden_states, attention_mask, params, args,
                               output_all_encoded_layers=False,
                               compute_dtype=jnp.bfloat16)
    final = jax.block_until_ready(outs[-1])
    assert final.shape == (B, L, args.hidden_size)
    assert bool(jnp.all(jnp.isfinite(final)))
    print("KERNEL_OK")
</pallas_src>

<mosaic_0001>
module attributes {stable_mosaic.version = 11 : i64} {
  func.func @_matmul_bias_kernel(%arg0: i32, %arg1: i32, %arg2: i32, %arg3: memref<16x32xf32, #tpu.memory_space<vmem>>, %arg4: memref<32x96xbf16, #tpu.memory_space<vmem>>, %arg5: memref<1x96xf32, #tpu.memory_space<vmem>>, %arg6: memref<16x96xbf16, #tpu.memory_space<vmem>>, %arg7: memref<16x96xf32, #tpu.memory_space<vmem>>) attributes {dimension_semantics = [#tpu.dimension_semantics<parallel>, #tpu.dimension_semantics<parallel>, #tpu.dimension_semantics<arbitrary>], iteration_bounds = array<i64: 1, 1, 1>, scalar_prefetch = 0 : i64, scratch_operands = 1 : i64, tpu.core_type = #tpu.core_type<tc>, window_params = [{transform_indices = @transform_0, window_bounds = array<i64: 16, 32>}, {transform_indices = @transform_1, window_bounds = array<i64: 32, 96>}, {transform_indices = @transform_2, window_bounds = array<i64: 1, 96>}, {transform_indices = @transform_3, window_bounds = array<i64: 16, 96>}]} {
    %c0_i32 = arith.constant 0 : i32
    %0 = arith.cmpi eq, %arg2, %c0_i32 : i32
    %1 = arith.extui %0 : i1 to i32
    %c0_i32_0 = arith.constant 0 : i32
    %2 = arith.cmpi ne, %1, %c0_i32_0 : i32
    scf.if %2 {
      %cst_10 = arith.constant 0.000000e+00 : f32
      %13 = vector.broadcast %cst_10 : f32 to vector<16x96xf32>
      %c0_11 = arith.constant 0 : index
      %c0_12 = arith.constant 0 : index
      %14 = vector.load %arg7[%c0_11, %c0_12] : memref<16x96xf32, #tpu.memory_space<vmem>>, vector<16x96xf32>
      tpu.vector_store %arg7[%c0_11, %c0_12], %13 {strides = array<i32>} : memref<16x96xf32, #tpu.memory_space<vmem>>, vector<16x96xf32>,
    } else {
    }
    %c0 = arith.constant 0 : index
    %c0_1 = arith.constant 0 : index
    %3 = vector.load %arg7[%c0, %c0_1] : memref<16x96xf32, #tpu.memory_space<vmem>>, vector<16x96xf32>
    %c0_2 = arith.constant 0 : index
    %c0_3 = arith.constant 0 : index
    %4 = vector.load %arg3[%c0_2, %c0_3] : memref<16x32xf32, #tpu.memory_space<vmem>>, vector<16x32xf32>
    %5 = arith.truncf %4 : vector<16x32xf32> to vector<16x32xbf16>
    %c0_4 = arith.constant 0 : index
    %c0_5 = arith.constant 0 : index
    %6 = vector.load %arg4[%c0_4, %c0_5] : memref<32x96xbf16, #tpu.memory_space<vmem>>, vector<32x96xbf16>
    %cst = arith.constant dense<0.000000e+00> : vector<16x96xf32>
    %7 = tpu.matmul %5, %6, %cst {dimension_numbers = #tpu.dot_dimension_numbers<[1], [0], [0], [1], [0, 0, 1, 1], [], []>} : vector<16x32xbf16>, vector<32x96xbf16>, vector<16x96xf32> -> vector<16x96xf32>
    %8 = arith.addf %3, %7 : vector<16x96xf32>
    %c0_6 = arith.constant 0 : index
    %c0_7 = arith.constant 0 : index
    %9 = vector.load %arg7[%c0_6, %c0_7] : memref<16x96xf32, #tpu.memory_space<vmem>>, vector<16x96xf32>
    tpu.vector_store %arg7[%c0_6, %c0_7], %8 {strides = array<i32>} : memref<16x96xf32, #tpu.memory_space<vmem>>, vector<16x96xf32>,
    %c0_i32_8 = arith.constant 0 : i32
    %10 = arith.cmpi eq, %arg2, %c0_i32_8 : i32
    %11 = arith.extui %10 : i1 to i32
    %c0_i32_9 = arith.constant 0 : i32
    %12 = arith.cmpi ne, %11, %c0_i32_9 : i32
    scf.if %12 {
      %c0_10 = arith.constant 0 : index
      %c0_11 = arith.constant 0 : index
      %13 = vector.load %arg7[%c0_10, %c0_11] : memref<16x96xf32, #tpu.memory_space<vmem>>, vector<16x96xf32>
      %c0_12 = arith.constant 0 : index
      %c0_13 = arith.constant 0 : index
      %14 = vector.load %arg5[%c0_12, %c0_13] : memref<1x96xf32, #tpu.memory_space<vmem>>, vector<1x96xf32>
      %15 = vector.broadcast %14 : vector<1x96xf32> to vector<16x96xf32>
      %16 = arith.addf %13, %15 : vector<16x96xf32>
      %17 = arith.truncf %16 : vector<16x96xf32> to vector<16x96xbf16>
      %c0_14 = arith.constant 0 : index
      %c0_15 = arith.constant 0 : index
      %18 = vector.load %arg6[%c0_14, %c0_15] : memref<16x96xbf16, #tpu.memory_space<vmem>>, vector<16x96xbf16>
      tpu.vector_store %arg6[%c0_14, %c0_15], %17 {strides = array<i32>} : memref<16x96xbf16, #tpu.memory_space<vmem>>, vector<16x96xbf16>,
    } else {
    }
    return
  }
  func.func @transform_0(%arg0: i32, %arg1: i32, %arg2: i32) -> (i32, i32) {
    %c0_i32 = arith.constant 0 : i32
    return %arg0, %arg2 : i32, i32
  }
  func.func @transform_1(%arg0: i32, %arg1: i32, %arg2: i32) -> (i32, i32) {
    %c0_i32 = arith.constant 0 : i32
    return %arg2, %arg1 : i32, i32
  }
  func.func @transform_2(%arg0: i32, %arg1: i32, %arg2: i32) -> (i32, i32) {
    %c0_i32 = arith.constant 0 : i32
    %c0_i32_0 = arith.constant 0 : i32
    return %c0_i32, %arg1 : i32, i32
  }
  func.func @transform_3(%arg0: i32, %arg1: i32, %arg2: i32) -> (i32, i32) {
    %c0_i32 = arith.constant 0 : i32
    return %arg0, %arg1 : i32, i32
  }
}

</mosaic_0001>

<bundles_post_ra>
// kernel: tpu_custom_call.1
= control target key start
LH: loop header
LB: loop body
LE: loop exit
PB: predicated region body
PF: predicated region fallthrough
CT: control target
= control target key end

     0   :  { %8 = vsyncpa [#allocation4], 0  ;;  %s283_s0 = inlined_call_operand.hbm [shape: f32[16,32], index: 0, kind: input, shape index: {}]   ;;  %s284_s1 = inlined_call_operand.hbm [shape: bf16[32,96], index: 1, kind: input, shape index: {}]   ;;  %s285_s2 = inlined_call_operand.vmem [shape: f32[1,96], index: 2, kind: input, shape index: {}]   ;;  %s286_s3 = inlined_call_operand.hbm [shape: bf16[16,96], index: 3, kind: output, shape index: {}]  }
   0x1   :  { %9 = vsyncpa [#allocation7], 0 }
   0x2   :  { %10 = vsyncpa [#allocation5], 0  ;;  %s15_s14 = sshll.u32 %s283_s0, 4  ;;  %s233_s15 = smov [#allocation3]   ;;  %s16_s14 = int_to_ptr.hbm [resolvable:$true] %s15_s14 }
   0x3   :  { %s17_s16 = sshll.u32 %s233_s15, 4  ;;  %s28_s19 = sshll.u32 %s284_s1, 4  ;;  %s18_s16 = int_to_ptr.vmem [resolvable:$true] %s17_s16  ;;  %s29_s19 = int_to_ptr.hbm [resolvable:$true] %s28_s19 }
   0x4   :  { %s234_s20 = smov 128   ;;  %s235_s21 = smov 8  }
   0x5   :  { %23 = dma.hbm_to_vmem [thread:$0]  %s16_s14, 256, %s18_s16, [#allocation4], %s234_s20, %s234_s20, %s235_s21  }
   0x6   :  { %s236_s22 = smov [#allocation6]   ;;  %s237_s24 = smov 64  }
   0x7   :  { %s30_s23 = sshll.u32 %s236_s22, 4  ;;  %s238_s25 = smov 4   ;;  %s31_s23 = int_to_ptr.vmem [resolvable:$true] %s30_s23 }
   0x8   :  { %36 = dma.hbm_to_vmem [thread:$0]  %s29_s19, 256, %s31_s23, [#allocation7], %s237_s24, %s237_s24, %s238_s25  }
   0x9   :  { %227 = dma.done.wait [#allocation4], 256  }
   0xa   :  { %228 = vsyncadd [#allocation4], 4294967040 }
   0xb   :  { %229 = dma.done.wait [#allocation7], 256  }
   0xc   :  { %230 = vsyncadd [#allocation7], 4294967040  ;;  %vm52_vm0 = vcmask 785408   ;;  %v239_v0 = vmov 0.0   ;;  %v145_v1 = vld [vmem:[#allocation6 + $0x8] sm:$0xff]  ;;  %v144_v2 = vld [vmem:[#allocation6] sm:$0xff] }
   0xd   :  { %53 = vst.msk [vmem:[#allocation2] sm:$0xff] %vm52_vm0, %v239_v0  ;;  %86 = vmatpush.bf16.msra.mxu0 %v145_v1  ;;  %v57_v3 = vld [vmem:[#allocation3] sm:$0xff]  ;;  %v58_v4 = vld [vmem:[#allocation3 + $0x8] sm:$0xff]  ;;  %vm76_vm1 = vcmask 261120   ;;  %v154_v10 = vld [vmem:[%s285_s2] ss:$0 sm:$0xff] }
   0xe   :  { %54 = vst.msk [vmem:[#allocation2 + $0x8] sm:$0xff] %vm52_vm0, %v239_v0  ;;  %v59_v5 = vpack.c.bf16 %v58_v4, %v57_v3  ;;  %vm112_vm2 = vcmask 781312   ;;  %s240_s26 = smov [#allocation8]   ;;  %s121_s30 = sshll.u32 %s286_s3, 4  ;;  %s122_s30 = int_to_ptr.hbm [resolvable:$true] %s121_s30 }
   0xf   :  { %s119_s27 = sshll.u32 %s240_s26, 4  ;;  %s120_s27 = int_to_ptr.vmem [resolvable:$true] %s119_s27 }
  0x11   :  { %87 = vmatpush.bf16.msra.mxu0 %v144_v2 }
  0x14   :  { %143 = vmatmul.msk.bf16.vlgmr.msra.gmra.mxu0 %vm76_vm1, %v59_v5  ;;  %v55_v6 = vld [vmem:[#allocation2] sm:$0xff] }
  0x15   :  { %v56_v9 = vld [vmem:[#allocation2 + $0x8] sm:$0xff] }
  0x91   :  { %v89_v7 = vpop.f32.mrf.mxu0 }
  0x92   :  { %v94_v8 = vadd.f32 %v89_v7, %v55_v6 }
  0x94   :  { %97 = vst.msk [vmem:[#allocation2] sm:$0xff] %vm52_vm0, %v94_v8 }
  0x99   :  { %v91_v11 = vpop.f32.mrf.mxu0 }
  0x9a   :  { %v95_v12 = vadd.f32 %v91_v11, %v56_v9 }
  0x9b   :  { %v102_v13 = vld [vmem:[#allocation2] sm:$0xff] }
  0x9c   :  { %98 = vst.msk [vmem:[#allocation2 + $0x8] sm:$0xff] %vm52_vm0, %v95_v12  ;;  %v108_v14 = vadd.f32 %v154_v10, %v102_v13 }
  0x9e   :  { %v110_v15 = vpack.c.bf16 %v108_v14, %v108_v14 }
  0xa0   :  { %113 = vst.msk [vmem:[#allocation8] sm:$0xf] %vm112_vm2, %v110_v15 }
  0xa3   :  { %v103_v16 = vld [vmem:[#allocation2 + $0x8] sm:$0xff] }
  0xa4   :  { %v109_v17 = vadd.f32 %v154_v10, %v103_v16 }
  0xa6   :  { %v111_v18 = vpack.c.bf16 %v109_v17, %v109_v17 }
  0xa8   :  { %114 = vst.msk [vmem:[#allocation8 + $0x4] sm:$0xf] %vm112_vm2, %v111_v18 }
  0xa9   :  { %127 = dma.vmem_to_hbm [thread:$0]  %s120_s27, 128, %s122_s30, [#allocation5], %s237_s24, %s237_s24, %s238_s25  }
  0xaa   :  { %231 = dma.done.wait [#allocation5], 128  }
  0xab   :  { %232 = vsyncadd [#allocation5], 4294967168 }
  0xac   :  { %132 = vsyncpa [#allocation4], 1 }
  0xad   :  { %133 = vsyncpa [#allocation7], 1 }
  0xae   :  { %134 = vsyncpa [#allocation5], 1 }

</bundles_post_ra>
